<compile_context>
chip_gen: v5e
topology: v5e:2x2
jax: 0.10.0
libtpu: 0.0.40
codegen_flags: <defaults>
</compile_context>

<pallas_src>
import functools

import jax
import jax.numpy as jnp
from jax import lax
from jax.experimental import pallas as pl
from jax.experimental.pallas import tpu as pltpu


def _round_up(x, m):
    return (x + m - 1) // m * m


def _vmem_limit_bytes():
    cap = 128 << 20
    try:
        cap = int(getattr(pltpu.get_tpu_info(), "vmem_capacity_bytes", cap))
    except Exception:
        pass
    # 25% headroom below physical (v7x: 64 MiB -> 48 MiB; v5e/v6e: 128 -> 96),
    # never request more than 100 MiB.
    return int(min(cap - cap // 4, 100 << 20))


# -----------------------------------------------------------------------------
# Kernel 1: hoisted, time-parallel input projection
#   gi = x @ W_ih^T + (b_ih with b_hr/b_hz folded in)
# -----------------------------------------------------------------------------
def input_proj_kernel(x_ref, wih_ref, bih_ref, gi_ref):
    tm, bp, i = x_ref.shape
    # Merge (Tm, Bp) -> rows: Bp is a multiple of 8, so this reshape is
    # layout-preserving (pure metadata), and the dot sees a well-filled M.
    x2 = x_ref[...].reshape(tm * bp, i)
    acc = jnp.dot(x2, wih_ref[...], preferred_element_type=jnp.float32)
    acc = acc + bih_ref[...]
    gi_ref[...] = acc.reshape(tm, bp, -1).astype(gi_ref.dtype)


# -----------------------------------------------------------------------------
# Kernel 2: sequential recurrence, Tt timesteps per grid iteration
# -----------------------------------------------------------------------------
def gru_seq_kernel(gi_ref, whh_hbm, bhn_ref, out_ref, whh_vmem, h_ref, *, hp):
    tb = pl.program_id(0)

    @pl.when(tb == 0)
    def _():
        # Single-buffered resident W_hh: one HBM->VMEM copy, reused across all
        # grid steps (scratch persists), instead of a double-buffered BlockSpec.
        pltpu.sync_copy(whh_hbm, whh_vmem)
        h_ref[...] = jnp.zeros_like(h_ref)

    whh = whh_vmem[...]                                  # (Hp, 3Hp), bf16
    bp = h_ref.shape[0]
    # Only b_hn survives in the recurrence (b_hr/b_hz folded into b_ih).
    # Broadcast it once per grid step, not once per unrolled timestep.
    bhn = jnp.broadcast_to(bhn_ref[...], (bp, hp)).astype(jnp.float32)

    def step(j, h):
        gi = gi_ref[j].astype(jnp.float32)               # (Bp, 3Hp)
        gh = jnp.dot(h.astype(whh.dtype), whh,           # bf16 MXU, f32 accum
                     preferred_element_type=jnp.float32)
        # Gate slices at multiples of Hp (multiple of 128): lane-aligned, free.
        r = jax.nn.sigmoid(gi[:, 0:hp] + gh[:, 0:hp])
        z = jax.nn.sigmoid(gi[:, hp:2 * hp] + gh[:, hp:2 * hp])
        n = jnp.tanh(gi[:, 2 * hp:] + r * (gh[:, 2 * hp:] + bhn))
        h_new = (1.0 - z) * n + z * h                    # all f32 gate math
        out_ref[j] = h_new.astype(out_ref.dtype)         # lane-dense store
        return h_new

    # TODO(synk): for Bp>=256 and Hp>=1024, chunk the gate math / dot N-dim to
    # avoid vreg spills in the unrolled body (check vst/vld slot_util first).
    h_ref[...] = lax.fori_loop(0, gi_ref.shape[0], step, h_ref[...], unroll=True)


# -----------------------------------------------------------------------------
# Wrapper
# -----------------------------------------------------------------------------
def gru_block_forward(x, w_ih, w_hh, b_ih, b_hh, hidden_size, *,
                      t_block=8, mxu_dtype=jnp.bfloat16):
    """x: (B, T, I) float32.  Returns (B, T, H) float32 (== unrolled nn.GRUCell)."""
    B, T, I = x.shape
    H = hidden_size
    f32 = jnp.float32

    # Padded sizes: lane-dense H, sublane-aligned B.
    Hp = _round_up(H, 128)
    Bp = _round_up(B, 8)
    Tt = max(1, min(t_block, T))                     # recurrence time block
    # Projection time block: aim for ~512 rows (Tm*Bp) per MXU call, as a
    # multiple of Tt so both kernels share one padded time extent Tp.
    tm_factor = max(1, 512 // (Tt * Bp))
    tm_factor = min(tm_factor, pl.cdiv(T, Tt))
    Tm = Tt * tm_factor
    Tp = _round_up(T, Tm)                            # multiple of Tm and of Tt
    n_tb = Tp // Tt
    vmem_limit = _vmem_limit_bytes()

    # --- weight / bias prep: gate-major, zero-padded (exact) --------------------
    w_ih_g = jnp.pad(w_ih.reshape(3, H, I).astype(f32),
                     ((0, 0), (0, Hp - H), (0, 0)))
    wih_t = jnp.transpose(w_ih_g, (2, 0, 1)).reshape(I, 3 * Hp).astype(mxu_dtype)
    w_hh_g = jnp.pad(w_hh.reshape(3, H, H).astype(f32),
                     ((0, 0), (0, Hp - H), (0, Hp - H)))
    whh_t = jnp.transpose(w_hh_g, (2, 0, 1)).reshape(Hp, 3 * Hp).astype(mxu_dtype)

    b_ih3 = b_ih.reshape(3, H).astype(f32)
    b_hh3 = b_hh.reshape(3, H).astype(f32)
    # Fold b_hr / b_hz into the hoisted projection bias (added linearly for the
    # r and z gates); only b_hn must stay in the recurrence (under the r* term).
    b_gi3 = b_ih3.at[0].add(b_hh3[0]).at[1].add(b_hh3[1])
    bih_p = jnp.pad(b_gi3, ((0, 0), (0, Hp - H))).reshape(1, 3 * Hp)
    bhn_p = jnp.pad(b_hh3[2:3], ((0, 0), (0, Hp - H)))               # (1, Hp)

    # --- input: time-major, padded, bf16 for the MXU ----------------------------
    x_tm = jnp.transpose(x.astype(f32), (1, 0, 2))                   # (T, B, I)
    x_tm = jnp.pad(x_tm, ((0, Tp - T), (0, Bp - B), (0, 0))).astype(mxu_dtype)

    # Column block for the projection: tile 3*Hp only when it is large.
    n_blk = 3 * Hp if 3 * Hp <= 2048 else Hp

    # --- kernel 1: hoisted input projection (parallel over time/column blocks) --
    gi = pl.pallas_call(
        input_proj_kernel,
        out_shape=jax.ShapeDtypeStruct((Tp, Bp, 3 * Hp), mxu_dtype),
        grid_spec=pltpu.PrefetchScalarGridSpec(
            num_scalar_prefetch=0,
            grid=(Tp // Tm, (3 * Hp) // n_blk),
            in_specs=[
                pl.BlockSpec((Tm, Bp, I), lambda m, n: (m, 0, 0)),
                pl.BlockSpec((I, n_blk), lambda m, n: (0, n)),
                pl.BlockSpec((1, n_blk), lambda m, n: (0, n)),
            ],
            out_specs=pl.BlockSpec((Tm, Bp, n_blk), lambda m, n: (m, 0, n)),
        ),
        compiler_params=pltpu.CompilerParams(
            dimension_semantics=("parallel", "parallel"),
            vmem_limit_bytes=vmem_limit),
    )(x_tm, wih_t, bih_p)

    # --- kernel 2: sequential recurrence (time axis "arbitrary") ----------------
    # TODO(synk): on v7x, add a leading "parallel" batch-block grid axis (2 TCs)
    # once Bp per core is >=128; on bandwidth-limited v5e, consider fusing the
    # input projection into this kernel to remove the gi HBM round-trip.
    out_tm = pl.pallas_call(
        functools.partial(gru_seq_kernel, hp=Hp),
        out_shape=jax.ShapeDtypeStruct((Tp, Bp, Hp), f32),
        grid_spec=pltpu.PrefetchScalarGridSpec(
            num_scalar_prefetch=0,
            grid=(n_tb,),
            in_specs=[
                pl.BlockSpec((Tt, Bp, 3 * Hp), lambda t: (t, 0, 0)),
                pl.BlockSpec(memory_space=pl.ANY),        # W_hh stays in HBM
                pl.BlockSpec((1, Hp), lambda t: (0, 0)),
            ],
            out_specs=pl.BlockSpec((Tt, Bp, Hp), lambda t: (t, 0, 0)),
            scratch_shapes=[
                pltpu.VMEM((Hp, 3 * Hp), mxu_dtype),      # resident W_hh (1 buffer)
                pltpu.VMEM((Bp, Hp), f32),                # carried hidden state
            ],
        ),
        compiler_params=pltpu.CompilerParams(
            dimension_semantics=("arbitrary",),
            vmem_limit_bytes=vmem_limit),
    )(gi, whh_t, bhn_p)

    # Strip padding, back to (B, T, H).
    return jnp.transpose(out_tm[:T, :B, :H], (1, 0, 2))


# -----------------------------------------------------------------------------
# Pure-JAX reference (lax.scan) matching torch.nn.GRUCell
# -----------------------------------------------------------------------------
def gru_block_ref(x, w_ih, w_hh, b_ih, b_hh, hidden_size):
    B, T, I = x.shape
    H = hidden_size

    def step(h, x_t):
        gi = x_t @ w_ih.T + b_ih
        gh = h @ w_hh.T + b_hh
        i_r, i_z, i_n = gi[:, :H], gi[:, H:2 * H], gi[:, 2 * H:]
        h_r, h_z, h_n = gh[:, :H], gh[:, H:2 * H], gh[:, 2 * H:]
        r = jax.nn.sigmoid(i_r + h_r)
        z = jax.nn.sigmoid(i_z + h_z)
        n = jnp.tanh(i_n + r * h_n)
        h_new = (1.0 - z) * n + z * h
        return h_new, h_new

    h0 = jnp.zeros((B, H), jnp.float32)
    _, ys = lax.scan(step, h0, jnp.transpose(x, (1, 0, 2)))
    return jnp.transpose(ys, (1, 0, 2))


if __name__ == "__main__":
    B, T, I, H = 2, 8, 4, 32

    key = jax.random.PRNGKey(0)
    kx, k1, k2, k3, k4 = jax.random.split(key, 5)

    x = jax.random.normal(kx, (B, T, I), dtype=jnp.float32)

    # nn.GRUCell-shaped params: U(-1/sqrt(H), 1/sqrt(H))
    bound = 1.0 / jnp.sqrt(jnp.float32(H))
    w_ih = jax.random.uniform(k1, (3 * H, I), jnp.float32, -bound, bound)
    w_hh = jax.random.uniform(k2, (3 * H, H), jnp.float32, -bound, bound)
    b_ih = jax.random.uniform(k3, (3 * H,), jnp.float32, -bound, bound)
    b_hh = jax.random.uniform(k4, (3 * H,), jnp.float32, -bound, bound)

    ref = gru_block_ref(x, w_ih, w_hh, b_ih, b_hh, H)

    # f32 MXU path: tight check of padding / bias-folding / recurrence structure.
    out_f32 = jax.block_until_ready(
        gru_block_forward(x, w_ih, w_hh, b_ih, b_hh, H, mxu_dtype=jnp.float32))
    assert out_f32.shape == (B, T, H)
    assert jnp.allclose(out_f32, ref, atol=1e-5, rtol=1e-5), "f32 path mismatch"

    # bf16 MXU path (performance default): bf16 matmul operands, f32 accumulation
    # and gate math -> relaxed tolerance vs the pure-f32 reference.
    out = jax.block_until_ready(gru_block_forward(x, w_ih, w_hh, b_ih, b_hh, H))
    assert out.shape == (B, T, H)
    assert jnp.allclose(out, ref, atol=3e-2, rtol=3e-2), "bf16 path mismatch"

    print("KERNEL_OK")
</pallas_src>

<mosaic_0001>
module attributes {stable_mosaic.version = 11 : i64} {
  func.func @input_proj_kernel(%arg0: i32, %arg1: i32, %arg2: memref<8x8x4xf32, #tpu.memory_space<vmem>>, %arg3: memref<4x384xf32, #tpu.memory_space<vmem>>, %arg4: memref<1x384xf32, #tpu.memory_space<vmem>>, %arg5: memref<8x8x384xf32, #tpu.memory_space<vmem>>) attributes {dimension_semantics = [#tpu.dimension_semantics<parallel>, #tpu.dimension_semantics<parallel>], iteration_bounds = array<i64: 1, 1>, scalar_prefetch = 0 : i64, scratch_operands = 0 : i64, tpu.core_type = #tpu.core_type<tc>, window_params = [{transform_indices = @transform_0, window_bounds = array<i64: 8, 8, 4>}, {transform_indices = @transform_1, window_bounds = array<i64: 4, 384>}, {transform_indices = @transform_2, window_bounds = array<i64: 1, 384>}, {transform_indices = @transform_3, window_bounds = array<i64: 8, 8, 384>}]} {
    %c0 = arith.constant 0 : index
    %c0_0 = arith.constant 0 : index
    %c0_1 = arith.constant 0 : index
    %0 = vector.load %arg2[%c0, %c0_0, %c0_1] : memref<8x8x4xf32, #tpu.memory_space<vmem>>, vector<8x8x4xf32>
    %1 = vector.shape_cast %0 : vector<8x8x4xf32> to vector<64x4xf32>
    %c0_2 = arith.constant 0 : index
    %c0_3 = arith.constant 0 : index
    %2 = vector.load %arg3[%c0_2, %c0_3] : memref<4x384xf32, #tpu.memory_space<vmem>>, vector<4x384xf32>
    %cst = arith.constant dense<0.000000e+00> : vector<64x384xf32>
    %3 = tpu.matmul %1, %2, %cst {dimension_numbers = #tpu.dot_dimension_numbers<[1], [0], [0], [1], [0, 0, 1, 1], [], []>} : vector<64x4xf32>, vector<4x384xf32>, vector<64x384xf32> -> vector<64x384xf32>
    %c0_4 = arith.constant 0 : index
    %c0_5 = arith.constant 0 : index
    %4 = vector.load %arg4[%c0_4, %c0_5] : memref<1x384xf32, #tpu.memory_space<vmem>>, vector<1x384xf32>
    %5 = vector.broadcast %4 : vector<1x384xf32> to vector<64x384xf32>
    %6 = arith.addf %3, %5 : vector<64x384xf32>
    %7 = vector.shape_cast %6 : vector<64x384xf32> to vector<8x8x384xf32>
    %c0_6 = arith.constant 0 : index
    %c0_7 = arith.constant 0 : index
    %c0_8 = arith.constant 0 : index
    %8 = vector.load %arg5[%c0_6, %c0_7, %c0_8] : memref<8x8x384xf32, #tpu.memory_space<vmem>>, vector<8x8x384xf32>
    tpu.vector_store %arg5[%c0_6, %c0_7, %c0_8], %7 {strides = array<i32>} : memref<8x8x384xf32, #tpu.memory_space<vmem>>, vector<8x8x384xf32>,
    return
  }
  func.func @transform_0(%arg0: i32, %arg1: i32) -> (i32, i32, i32) {
    %c0_i32 = arith.constant 0 : i32
    %c0_i32_0 = arith.constant 0 : i32
    %c0_i32_1 = arith.constant 0 : i32
    return %arg0, %c0_i32, %c0_i32_0 : i32, i32, i32
  }
  func.func @transform_1(%arg0: i32, %arg1: i32) -> (i32, i32) {
    %c0_i32 = arith.constant 0 : i32
    %c0_i32_0 = arith.constant 0 : i32
    return %c0_i32, %arg1 : i32, i32
  }
  func.func @transform_2(%arg0: i32, %arg1: i32) -> (i32, i32) {
    %c0_i32 = arith.constant 0 : i32
    %c0_i32_0 = arith.constant 0 : i32
    return %c0_i32, %arg1 : i32, i32
  }
  func.func @transform_3(%arg0: i32, %arg1: i32) -> (i32, i32, i32) {
    %c0_i32 = arith.constant 0 : i32
    %c0_i32_0 = arith.constant 0 : i32
    return %arg0, %c0_i32, %arg1 : i32, i32, i32
  }
}

</mosaic_0001>

<bundles_post_ra>
// kernel: tpu_custom_call.1
= control target key start
LH: loop header
LB: loop body
LE: loop exit
PB: predicated region body
PF: predicated region fallthrough
CT: control target
= control target key end

     0   :  { %s416_s0 = inlined_call_operand.vmem [shape: f32[8,8,4], index: 0, kind: input, shape index: {}]   ;;  %s417_s1 = inlined_call_operand.vmem [shape: f32[4,384], index: 1, kind: input, shape index: {}]   ;;  %s418_s2 = inlined_call_operand.vmem [shape: f32[1,384], index: 2, kind: input, shape index: {}]   ;;  %s419_s3 = inlined_call_operand.hbm [shape: f32[8,8,384], index: 3, kind: output, shape index: {}]  }
   0x1   :  { %v23_v0 = vld [vmem:[%s417_s1] sm:$0xff]  ;;  %v24_v1 = vld [vmem:[%s417_s1 + $0x8] sm:$0xf] }
   0x2   :  { %35 = vst [vmem:[#allocation1] ss:$2 sm:$0xff] %v23_v0 }
   0x3   :  { %37 = vst [vmem:[#allocation1 + $0x10] ss:$2 sm:$0xff] %v24_v1 }
   0x4   :  { %8 = vsyncpa [#allocation3], 0  ;;  %vm66_vm0 = vcmask 1043456   ;;  %v21_v2 = vld [vmem:[%s416_s0 + $0x30] sm:$0xff]  ;;  %vm41_vm1 = vcmask 31744   ;;  %v15_v4 = vld [vmem:[%s416_s0] sm:$0xff] }
   0x5   :  { %v22_v7 = vld [vmem:[%s416_s0 + $0x38] sm:$0xff]  ;;  %v16_v8 = vld [vmem:[%s416_s0 + $0x8] sm:$0xff]  ;;  %v17_v9 = vld [vmem:[%s416_s0 + $0x10] sm:$0xff]  ;;  %s226_s8 = sshll.u32 %s419_s3, 4  ;;  %s298_s9 = smov 384   ;;  %s227_s8 = int_to_ptr.hbm [resolvable:$true] %s226_s8 }
   0x6   :  { %v18_v10 = vld [vmem:[%s416_s0 + $0x18] sm:$0xff]  ;;  %v19_v11 = vld [vmem:[%s416_s0 + $0x20] sm:$0xff]  ;;  %v20_v12 = vld [vmem:[%s416_s0 + $0x28] sm:$0xff]  ;;  %s297_s0 = smov [#allocation2]   ;;  %s299_s10 = smov 24  }
   0x7   :  { %v25_v13 = vld [vmem:[%s418_s2] sm:$0x7]  ;;  %s224_s2 = sshll.u32 %s297_s0, 4  ;;  %s225_s2 = int_to_ptr.vmem [resolvable:$true] %s224_s2 }
   0x8   :  { %v383_v14 = vperm.slane %v25_v13, 0  ;;  %v385_v15 = vperm.slane %v25_v13, 1  ;;  %v389_v20 = vperm.slane %v25_v13, 2 }
   0x9   :  { %v38_v3 = vld.sshfl [vmem:[#allocation1] sm:$0xff pattern:$0x75316420]  ;;  %v39_v6 = vld.sshfl [vmem:[#allocation1 + $0x8] sm:$0xff pattern:$0x75316420] }
   0xa   :  { %265 = vmatpush.msk.msra.mxu3 %vm66_vm0, %v38_v3  ;;  %v40_v5 = vld.sshfl [vmem:[#allocation1 + $0x10] sm:$0xff pattern:$0x75316420]  ;;  %238 = vmatpush.msk.msra.mxu0 %vm66_vm0, %v38_v3 }
   0xb   :  { %256 = vmatpush.msk.msra.mxu2 %vm66_vm0, %v40_v5  ;;  %245 = vmatmul.msk.f32.vlgmr.msra.gmra.mxu3 %vm41_vm1, %v21_v2 }
   0xc   :  { %266 = vmatpush.msk.msrb.mxu3 %vm66_vm0, %v39_v6  ;;  %257 = vmatmul.msk.f32.vlgmr.msra.gmra.mxu2 %vm41_vm1, %v15_v4 }
   0xd   :  { %247 = vmatpush.msk.msra.mxu1 %vm66_vm0, %v39_v6  ;;  %239 = vmatmul.msk.f32.vlgmr.msra.gmra.mxu0 %vm41_vm1, %v15_v4 }
   0xe   :  { %248 = vmatmul.msk.f32.vlgmr.msra.gmra.mxu1 %vm41_vm1, %v15_v4  ;;  %267 = vmatpush.msk.msra.mxu3 %vm66_vm0, %v40_v5 }
  0x13   :  { %246 = vmatmul.msk.f32.gmra.mxu3 %vm41_vm1, %v22_v7 }
  0x14   :  { %258 = vmatmul.msk.f32.gmra.mxu2 %vm41_vm1, %v16_v8 }
  0x15   :  { %240 = vmatmul.msk.f32.gmra.mxu0 %vm41_vm1, %v16_v8 }
  0x16   :  { %249 = vmatmul.msk.f32.gmra.mxu1 %vm41_vm1, %v16_v8 }
  0x1b   :  { %254 = vmatmul.msk.f32.vlgmr.msrb.gmra.mxu3 %vm41_vm1, %v21_v2 }
  0x1c   :  { %259 = vmatmul.msk.f32.gmra.mxu2 %vm41_vm1, %v17_v9 }
  0x1d   :  { %241 = vmatmul.msk.f32.gmra.mxu0 %vm41_vm1, %v17_v9 }
  0x1e   :  { %250 = vmatmul.msk.f32.gmra.mxu1 %vm41_vm1, %v17_v9 }
  0x23   :  { %255 = vmatmul.msk.f32.gmra.mxu3 %vm41_vm1, %v22_v7 }
  0x24   :  { %260 = vmatmul.msk.f32.gmra.mxu2 %vm41_vm1, %v18_v10 }
  0x25   :  { %242 = vmatmul.msk.f32.gmra.mxu0 %vm41_vm1, %v18_v10 }
  0x26   :  { %251 = vmatmul.msk.f32.gmra.mxu1 %vm41_vm1, %v18_v10 }
  0x2b   :  { %263 = vmatmul.msk.f32.vlgmr.msra.gmra.mxu3 %vm41_vm1, %v21_v2 }
  0x2c   :  { %261 = vmatmul.msk.f32.gmra.mxu2 %vm41_vm1, %v19_v11 }
  0x2d   :  { %243 = vmatmul.msk.f32.gmra.mxu0 %vm41_vm1, %v19_v11 }
  0x2e   :  { %252 = vmatmul.msk.f32.gmra.mxu1 %vm41_vm1, %v19_v11 }
  0x33   :  { %264 = vmatmul.msk.f32.gmra.mxu3 %vm41_vm1, %v22_v7 }
  0x34   :  { %262 = vmatmul.msk.f32.gmra.mxu2 %vm41_vm1, %v20_v12 }
  0x35   :  { %244 = vmatmul.msk.f32.gmra.mxu0 %vm41_vm1, %v20_v12 }
  0x36   :  { %253 = vmatmul.msk.f32.gmra.mxu1 %vm41_vm1, %v20_v12 }
  0x8a   :  { %v90_v16 = vpop.f32.mrf.mxu0 }
  0x8b   :  { %v91_v17 = vadd.f32 %v90_v16, %v383_v14  ;;  %v131_v18 = vpop.f32.mrf.mxu1 }
  0x8c   :  { %v132_v19 = vadd.f32 %v131_v18, %v385_v15 }
  0x8d   :  { %196 = vst [vmem:[#allocation2] sm:$0xff] %v91_v17 }
  0x8e   :  { %v108_v21 = vpop.f32.mrf.mxu3  ;;  %197 = vst [vmem:[#allocation2 + $0x8] sm:$0xff] %v132_v19 }
  0x8f   :  { %v109_v22 = vadd.f32 %v108_v21, %v383_v14  ;;  %v172_v23 = vpop.f32.mrf.mxu2 }
  0x90   :  { %v173_v24 = vadd.f32 %v172_v23, %v389_v20 }
  0x91   :  { %214 = vst [vmem:[#allocation2 + $0x90] sm:$0xff] %v109_v22 }
  0x92   :  { %198 = vst [vmem:[#allocation2 + $0x10] sm:$0xff] %v173_v24  ;;  %v93_v25 = vpop.f32.mrf.mxu0 }
  0x93   :  { %v94_v26 = vadd.f32 %v93_v25, %v383_v14  ;;  %v134_v27 = vpop.f32.mrf.mxu1 }
  0x94   :  { %v135_v28 = vadd.f32 %v134_v27, %v385_v15 }
  0x95   :  { %199 = vst [vmem:[#allocation2 + $0x18] sm:$0xff] %v94_v26 }
  0x96   :  { %v111_v29 = vpop.f32.mrf.mxu3  ;;  %200 = vst [vmem:[#allocation2 + $0x20] sm:$0xff] %v135_v28 }
  0x97   :  { %v112_v30 = vadd.f32 %v111_v29, %v383_v14  ;;  %v175_v31 = vpop.f32.mrf.mxu2 }
  0x98   :  { %v176_v32 = vadd.f32 %v175_v31, %v389_v20 }
  0x99   :  { %217 = vst [vmem:[#allocation2 + $0xa8] sm:$0xff] %v112_v30 }
  0x9a   :  { %201 = vst [vmem:[#allocation2 + $0x28] sm:$0xff] %v176_v32  ;;  %v96_v33 = vpop.f32.mrf.mxu0 }
  0x9b   :  { %v97_v34 = vadd.f32 %v96_v33, %v383_v14  ;;  %v137_v35 = vpop.f32.mrf.mxu1 }
  0x9c   :  { %v138_v36 = vadd.f32 %v137_v35, %v385_v15 }
  0x9d   :  { %202 = vst [vmem:[#allocation2 + $0x30] sm:$0xff] %v97_v34 }
  0x9e   :  { %203 = vst [vmem:[#allocation2 + $0x38] sm:$0xff] %v138_v36  ;;  %v149_v37 = vpop.f32.mrf.mxu3 }
  0x9f   :  { %v150_v38 = vadd.f32 %v149_v37, %v385_v15  ;;  %v178_v39 = vpop.f32.mrf.mxu2 }
  0xa0   :  { %v179_v40 = vadd.f32 %v178_v39, %v389_v20 }
  0xa1   :  { %215 = vst [vmem:[#allocation2 + $0x98] sm:$0xff] %v150_v38 }
  0xa2   :  { %204 = vst [vmem:[#allocation2 + $0x40] sm:$0xff] %v179_v40  ;;  %v99_v41 = vpop.f32.mrf.mxu0 }
  0xa3   :  { %v100_v42 = vadd.f32 %v99_v41, %v383_v14  ;;  %v140_v43 = vpop.f32.mrf.mxu1 }
  0xa4   :  { %v141_v44 = vadd.f32 %v140_v43, %v385_v15 }
  0xa5   :  { %205 = vst [vmem:[#allocation2 + $0x48] sm:$0xff] %v100_v42 }
  0xa6   :  { %206 = vst [vmem:[#allocation2 + $0x50] sm:$0xff] %v141_v44  ;;  %v152_v45 = vpop.f32.mrf.mxu3 }
  0xa7   :  { %v153_v46 = vadd.f32 %v152_v45, %v385_v15  ;;  %v181_v47 = vpop.f32.mrf.mxu2 }
  0xa8   :  { %v182_v48 = vadd.f32 %v181_v47, %v389_v20 }
  0xa9   :  { %218 = vst [vmem:[#allocation2 + $0xb0] sm:$0xff] %v153_v46 }
  0xaa   :  { %207 = vst [vmem:[#allocation2 + $0x58] sm:$0xff] %v182_v48  ;;  %v102_v49 = vpop.f32.mrf.mxu0 }
  0xab   :  { %v103_v50 = vadd.f32 %v102_v49, %v383_v14  ;;  %v143_v51 = vpop.f32.mrf.mxu1 }
  0xac   :  { %v144_v52 = vadd.f32 %v143_v51, %v385_v15 }
  0xad   :  { %208 = vst [vmem:[#allocation2 + $0x60] sm:$0xff] %v103_v50 }
  0xae   :  { %209 = vst [vmem:[#allocation2 + $0x68] sm:$0xff] %v144_v52  ;;  %v190_v53 = vpop.f32.mrf.mxu3 }
  0xaf   :  { %v184_v54 = vpop.f32.mrf.mxu2  ;;  %v191_v55 = vadd.f32 %v190_v53, %v389_v20 }
  0xb0   :  { %v185_v56 = vadd.f32 %v184_v54, %v389_v20 }
  0xb1   :  { %216 = vst [vmem:[#allocation2 + $0xa0] sm:$0xff] %v191_v55 }
  0xb2   :  { %210 = vst [vmem:[#allocation2 + $0x70] sm:$0xff] %v185_v56  ;;  %v105_v57 = vpop.f32.mrf.mxu0 }
  0xb3   :  { %v106_v58 = vadd.f32 %v105_v57, %v383_v14  ;;  %v146_v59 = vpop.f32.mrf.mxu1 }
  0xb4   :  { %v147_v60 = vadd.f32 %v146_v59, %v385_v15 }
  0xb5   :  { %211 = vst [vmem:[#allocation2 + $0x78] sm:$0xff] %v106_v58 }
  0xb6   :  { %212 = vst [vmem:[#allocation2 + $0x80] sm:$0xff] %v147_v60  ;;  %v193_v61 = vpop.f32.mrf.mxu3 }
  0xb7   :  { %v187_v62 = vpop.f32.mrf.mxu2  ;;  %v194_v63 = vadd.f32 %v193_v61, %v389_v20 }
  0xb8   :  { %v188_v0 = vadd.f32 %v187_v62, %v389_v20 }
  0xb9   :  { %219 = vst [vmem:[#allocation2 + $0xb8] sm:$0xff] %v194_v63 }
  0xba   :  { %213 = vst [vmem:[#allocation2 + $0x88] sm:$0xff] %v188_v0 }
  0xbb   :  { %232 = dma.vmem_to_hbm [thread:$0]  %s225_s2, 3072, %s227_s8, [#allocation3], %s298_s9, %s298_s9, %s299_s10  }
  0xbc   :  { %295 = dma.done.wait [#allocation3], 3072  }
  0xbd   :  { %296 = vsyncadd [#allocation3], 4294964224 }
  0xbe   :  { %237 = vsyncpa [#allocation3], 1 }

</bundles_post_ra>
